<compile_context>
chip_gen: v6e
topology: v6e:2x2x1
jax: 0.10.0
libtpu: 0.0.40
codegen_flags: <defaults>
</compile_context>

<pallas_src>
import functools

import jax
import jax.numpy as jnp
from jax.experimental import pallas as pl
from jax.experimental.pallas import tpu as pltpu

_LANES = 128
_H1 = 16
_H2 = 32

# Static slab layout (rows; every offset is a multiple of 8, weights occupy a
# full 128-row x 128-lane tile so the matmuls contract over full lanes).
_ROW_W1 = 0        # (128, 128)  valid [0:obs,  0:H1]
_ROW_B1 = 128      # (  8, 128)  valid [0:1,    0:H1]
_ROW_W2 = 136      # (128, 128)  valid [0:H1,   0:H2]
_ROW_B2 = 264      # (  8, 128)  valid [0:1,    0:H2]
_ROW_WH = 272      # (128, 128)  valid [0:H2,   0:2*act]   (mean|stddev fused)
_ROW_BH = 400      # (  8, 128)  valid [0:1,    0:2*act]
_SLAB_ROWS = 408


def _round_up(n, m):
    return -(-n // m) * m


def pack_params(params):
    """Pack all 8 parameter tensors into one (408, 128) f32 slab.

    Call this ONCE per parameter update (not per forward call) and reuse the
    returned slab across forward calls.
    """
    wh = jnp.concatenate([params["wm"], params["ws"]], axis=1)   # (H2, 2*act)
    bh = jnp.concatenate([params["bm"], params["bs"]], axis=1)   # (1, 2*act)

    blocks = (
        ("w1", params["w1"], _ROW_W1),
        ("b1", params["b1"], _ROW_B1),
        ("w2", params["w2"], _ROW_W2),
        ("b2", params["b2"], _ROW_B2),
        ("w_heads", wh, _ROW_WH),
        ("b_heads", bh, _ROW_BH),
    )
    slab = jnp.zeros((_SLAB_ROWS, _LANES), jnp.float32)
    for name, blk, row in blocks:
        nr, nc = blk.shape
        if nr > _LANES or nc > _LANES:
            raise ValueError(
                f"parameter block {name!r} has shape {blk.shape}; both dims "
                f"must be <= {_LANES} (obs_dims <= 128, 2*action_dims <= 128)")
        slab = slab.at[row:row + nr, :nc].set(blk.astype(jnp.float32))
    return slab


def _make_kernel(act_dims):
    def policy_kernel(x_ref, p_ref, out_ref):
        x = x_ref[...].astype(jnp.float32)                # (8, 128), zero-padded

        # Full-tile static views into the parameter slab (no lane slicing).
        w1 = p_ref[_ROW_W1:_ROW_W1 + _LANES, :]
        b1 = p_ref[_ROW_B1:_ROW_B1 + 1, :]
        w2 = p_ref[_ROW_W2:_ROW_W2 + _LANES, :]
        b2 = p_ref[_ROW_B2:_ROW_B2 + 1, :]
        wh = p_ref[_ROW_WH:_ROW_WH + _LANES, :]
        bh = p_ref[_ROW_BH:_ROW_BH + 1, :]

        # shared_net: Linear -> Tanh -> Linear -> Tanh (zero padding stays zero
        # through the zero-padded weights/biases and tanh(0) == 0).
        h = jnp.tanh(jnp.dot(x, w1, preferred_element_type=jnp.float32) + b1)
        h = jnp.tanh(jnp.dot(h, w2, preferred_element_type=jnp.float32) + b2)

        # Fused mean|stddev head: one matmul, one bias add.
        z = jnp.dot(h, wh, preferred_element_type=jnp.float32) + bh

        # Columns [0, act) are the mean (identity); columns [act, ...) get a
        # numerically stable softplus log(1 + exp(.)) == logaddexp(0, .).
        # Columns >= 2*act are padding and are sliced away in the wrapper.
        col = jax.lax.broadcasted_iota(jnp.int32, z.shape, 1)
        out_ref[...] = jnp.where(col < act_dims, z, jnp.logaddexp(0.0, z))

    return policy_kernel


@functools.partial(jax.jit, static_argnames=("act_dims",))
def policy_network_forward(x, slab, act_dims):
    """x: (B, obs_dims), slab: pre-packed (408, 128) params from pack_params().

    Returns (action_means, action_stddevs), each (B, act_dims).
    """
    B, obs_dims = x.shape
    B_pad = _round_up(B, 8)

    # Layout plumbing only (no value prep): present a lane-dense (8, 128)
    # input tile so all matmuls and the output store are full, unmasked tiles.
    x_pad = jnp.zeros((B_pad, _LANES), x.dtype).at[:B, :obs_dims].set(x)

    kernel = _make_kernel(act_dims)

    def full(shape):
        return pl.BlockSpec(shape, lambda: (0,) * len(shape),
                            memory_space=pltpu.MemorySpace.VMEM)

    # Honest (padded-tile) cost so XLA does not schedule around this
    # essentially-free kernel as if it were expensive.
    flops = 2 * B_pad * _LANES * _LANES * 3
    transcendentals = 4 * B_pad * _LANES                  # 2x tanh + exp/log
    bytes_accessed = (x_pad.size + slab.size + B_pad * _LANES) * 4

    out = pl.pallas_call(
        kernel,
        grid=(),
        in_specs=[full((B_pad, _LANES)), full((_SLAB_ROWS, _LANES))],
        out_specs=full((B_pad, _LANES)),
        out_shape=jax.ShapeDtypeStruct((B_pad, _LANES), jnp.float32),
        cost_estimate=pl.CostEstimate(flops=flops,
                                      transcendentals=transcendentals,
                                      bytes_accessed=bytes_accessed),
    )(x_pad, slab)

    return out[:B, :act_dims], out[:B, act_dims:2 * act_dims]


def init_params(key, obs_dims, act_dims):
    """PyTorch-Linear-style init (U[-1/sqrt(fan_in), +...]); weights stored (in, out)."""
    def linear(key, fan_in, fan_out):
        kw, kb = jax.random.split(key)
        bound = 1.0 / jnp.sqrt(float(fan_in))
        w = jax.random.uniform(kw, (fan_in, fan_out), jnp.float32, -bound, bound)
        b = jax.random.uniform(kb, (1, fan_out), jnp.float32, -bound, bound)
        return w, b

    k1, k2, k3, k4 = jax.random.split(key, 4)
    w1, b1 = linear(k1, obs_dims, _H1)
    w2, b2 = linear(k2, _H1, _H2)
    wm, bm = linear(k3, _H2, act_dims)
    ws, bs = linear(k4, _H2, act_dims)
    return {"w1": w1, "b1": b1, "w2": w2, "b2": b2,
            "wm": wm, "bm": bm, "ws": ws, "bs": bs}


def policy_network_ref(x, params):
    """Plain-JAX reference for correctness checking."""
    x = x.astype(jnp.float32)
    h = jnp.tanh(x @ params["w1"] + params["b1"])
    h = jnp.tanh(h @ params["w2"] + params["b2"])
    mean = h @ params["wm"] + params["bm"]
    std = jnp.logaddexp(0.0, h @ params["ws"] + params["bs"])    # stable softplus
    return mean, std


if __name__ == "__main__":
    obs_dims, act_dims, batch = 8, 2, 4

    key = jax.random.PRNGKey(0)
    kx, kp = jax.random.split(key)
    x = jax.random.normal(kx, (batch, obs_dims), dtype=jnp.float32)
    params = init_params(kp, obs_dims, act_dims)

    # Pack ONCE (outside the forward path) and reuse the slab every call.
    slab = jax.device_put(pack_params(params))

    means, stds = policy_network_forward(x, slab, act_dims)
    jax.block_until_ready((means, stds))
    # Second call reuses the cached slab and the compiled kernel (no repacking).
    means, stds = policy_network_forward(x, slab, act_dims)
    jax.block_until_ready((means, stds))

    ref_means, ref_stds = policy_network_ref(x, params)
    assert means.shape == (batch, act_dims) and stds.shape == (batch, act_dims)
    assert jnp.allclose(means, ref_means, atol=1e-5, rtol=1e-5)
    assert jnp.allclose(stds, ref_stds, atol=1e-5, rtol=1e-5)
    assert bool(jnp.all(stds > 0.0))

    print("KERNEL_OK")
</pallas_src>

<mosaic_0001>
module attributes {stable_mosaic.version = 11 : i64} {
  func.func @policy_kernel(%arg0: memref<8x128xf32, #tpu.memory_space<vmem>>, %arg1: memref<408x128xf32, #tpu.memory_space<vmem>>, %arg2: memref<8x128xf32, #tpu.memory_space<vmem>>) attributes {dimension_semantics = [], scalar_prefetch = 0 : i64, scratch_operands = 0 : i64, tpu.core_type = #tpu.core_type<tc>} {
    %c0 = arith.constant 0 : index
    %c0_0 = arith.constant 0 : index
    %0 = vector.load %arg0[%c0, %c0_0] : memref<8x128xf32, #tpu.memory_space<vmem>>, vector<8x128xf32>
    %c0_1 = arith.constant 0 : index
    %c0_2 = arith.constant 0 : index
    %1 = vector.load %arg1[%c0_1, %c0_2] : memref<408x128xf32, #tpu.memory_space<vmem>>, vector<128x128xf32>
    %c128 = arith.constant 128 : index
    %c0_3 = arith.constant 0 : index
    %2 = vector.load %arg1[%c128, %c0_3] : memref<408x128xf32, #tpu.memory_space<vmem>>, vector<1x128xf32>
    %c136 = arith.constant 136 : index
    %c0_4 = arith.constant 0 : index
    %3 = vector.load %arg1[%c136, %c0_4] : memref<408x128xf32, #tpu.memory_space<vmem>>, vector<128x128xf32>
    %c264 = arith.constant 264 : index
    %c0_5 = arith.constant 0 : index
    %4 = vector.load %arg1[%c264, %c0_5] : memref<408x128xf32, #tpu.memory_space<vmem>>, vector<1x128xf32>
    %c272 = arith.constant 272 : index
    %c0_6 = arith.constant 0 : index
    %5 = vector.load %arg1[%c272, %c0_6] : memref<408x128xf32, #tpu.memory_space<vmem>>, vector<128x128xf32>
    %c400 = arith.constant 400 : index
    %c0_7 = arith.constant 0 : index
    %6 = vector.load %arg1[%c400, %c0_7] : memref<408x128xf32, #tpu.memory_space<vmem>>, vector<1x128xf32>
    %cst = arith.constant dense<0.000000e+00> : vector<8x128xf32>
    %7 = tpu.matmul %0, %1, %cst {dimension_numbers = #tpu.dot_dimension_numbers<[1], [0], [0], [1], [0, 0, 1, 1], [], []>} : vector<8x128xf32>, vector<128x128xf32>, vector<8x128xf32> -> vector<8x128xf32>
    %8 = vector.broadcast %2 : vector<1x128xf32> to vector<8x128xf32>
    %9 = arith.addf %7, %8 : vector<8x128xf32>
    %10 = math.tanh %9 : vector<8x128xf32>
    %cst_8 = arith.constant dense<0.000000e+00> : vector<8x128xf32>
    %11 = tpu.matmul %10, %3, %cst_8 {dimension_numbers = #tpu.dot_dimension_numbers<[1], [0], [0], [1], [0, 0, 1, 1], [], []>} : vector<8x128xf32>, vector<128x128xf32>, vector<8x128xf32> -> vector<8x128xf32>
    %12 = vector.broadcast %4 : vector<1x128xf32> to vector<8x128xf32>
    %13 = arith.addf %11, %12 : vector<8x128xf32>
    %14 = math.tanh %13 : vector<8x128xf32>
    %cst_9 = arith.constant dense<0.000000e+00> : vector<8x128xf32>
    %15 = tpu.matmul %14, %5, %cst_9 {dimension_numbers = #tpu.dot_dimension_numbers<[1], [0], [0], [1], [0, 0, 1, 1], [], []>} : vector<8x128xf32>, vector<128x128xf32>, vector<8x128xf32> -> vector<8x128xf32>
    %16 = vector.broadcast %6 : vector<1x128xf32> to vector<8x128xf32>
    %17 = arith.addf %15, %16 : vector<8x128xf32>
    %18 = tpu.iota {dimensions = array<i32: 1>} : vector<8x128xi32>
    %c2_i32 = arith.constant 2 : i32
    %19 = vector.broadcast %c2_i32 : i32 to vector<8x128xi32>
    %20 = arith.cmpi slt, %18, %19 : vector<8x128xi32>
    %cst_10 = arith.constant 0.000000e+00 : f32
    %21 = vector.broadcast %cst_10 : f32 to vector<8x128xf32>
    %22 = arith.maximumf %21, %17 : vector<8x128xf32>
    %23 = vector.broadcast %cst_10 : f32 to vector<8x128xf32>
    %24 = arith.subf %23, %17 : vector<8x128xf32>
    %25 = arith.cmpf one, %24, %24 : vector<8x128xf32>
    %26 = vector.broadcast %cst_10 : f32 to vector<8x128xf32>
    %27 = arith.addf %26, %17 : vector<8x128xf32>
    %28 = math.absf %24 : vector<8x128xf32>
    %cst_11 = arith.constant 0.000000e+00 : f32
    %29 = vector.broadcast %cst_11 : f32 to vector<8x128xf32>
    %30 = arith.subf %29, %28 : vector<8x128xf32>
    %31 = math.exp %30 : vector<8x128xf32>
    %32 = math.log1p %31 : vector<8x128xf32>
    %33 = arith.addf %22, %32 : vector<8x128xf32>
    %34 = arith.select %25, %27, %33 : vector<8x128xi1>, vector<8x128xf32>
    %35 = arith.select %20, %17, %34 : vector<8x128xi1>, vector<8x128xf32>
    %c0_12 = arith.constant 0 : index
    %c0_13 = arith.constant 0 : index
    %36 = vector.load %arg2[%c0_12, %c0_13] : memref<8x128xf32, #tpu.memory_space<vmem>>, vector<8x128xf32>
    tpu.vector_store %arg2[%c0_12, %c0_13], %35 {strides = array<i32>} : memref<8x128xf32, #tpu.memory_space<vmem>>, vector<8x128xf32>,
    return
  }
}

</mosaic_0001>

<bundles_post_ra>
// kernel: policy_network_forward.1
= control target key start
LH: loop header
LB: loop body
LE: loop exit
PB: predicated region body
PF: predicated region fallthrough
CT: control target
= control target key end

     0   :  { %7 = vsyncpa [#allocation3], 0  ;;  %s524_s9 = smov [#allocation2]   ;;  %s607_s0 = inlined_call_operand.vmem [shape: f32[8,128], index: 0, kind: input, shape index: {}]   ;;  %s608_s1 = inlined_call_operand.hbm [shape: f32[408,128], index: 1, kind: input, shape index: {}]   ;;  %s609_s2 = inlined_call_operand.vmem [shape: f32[8,128], index: 2, kind: output, shape index: {}]  }
   0x1   :  { %s15_s10 = sshll.u32 %s524_s9, 4  ;;  %s16_s10 = int_to_ptr.vmem [resolvable:$true] %s15_s10 }
   0x2   :  { %s510_s11 = scalar_lea.vmem %s16_s10, 6528  ;;  %p515_p1 = scmp.lt.s32.totalorder %s16_s10, %s16_s10 }
   0x3   :  { %p511_p0 = scmp.ne.s32.totalorder %s16_s10, %s510_s11  ;;  %p516_p2 = scmp.lt.s32.totalorder %s510_s11, %s510_s11 }
   0x5   :  { %p517_p3 = por %p516_p2, %p515_p1 }
   0x7   :  { %p518_p4 = pnand %p517_p3, %p511_p0 }
   0x9   :  { %521 = shalt.err (!%p518_p4)
}
   0xa   :  { %s525_s12 = smov 128   ;;  %s526_s13 = smov 8  }
   0xb   :  { %21 = dma.hbm_to_vmem [thread:$0]  %s608_s1, 6528, %s16_s10, [#allocation3], %s525_s12, %s525_s12, %s526_s13  }
   0xc   :  { %522 = dma.done.wait [#allocation3], 6528  }
   0xd   :  { %523 = vsyncadd [#allocation3], 4294960768  ;;  %v527_v0 = vmov 0.0   ;;  %vm528_vm0 = vmmov 0   ;;  %v41_v1 = vld [vmem:[#allocation2 + $0x78] sm:$0xff]  ;;  %v40_v2 = vld [vmem:[#allocation2 + $0x70] sm:$0xff] }
   0xe   :  { %384 = vmatprep.subr.mxu0 %v527_v0  ;;  %416 = vmatprep.mubr.msk.f32.mxu0 %vm528_vm0, %v527_v0  ;;  %v39_v3 = vld [vmem:[#allocation2 + $0x68] sm:$0xff]  ;;  %v38_v4 = vld [vmem:[#allocation2 + $0x60] sm:$0xff]  ;;  %v37_v6 = vld [vmem:[#allocation2 + $0x58] sm:$0xff] }
   0xf   :  { %419 = vmatprep.subr.mxu1 %v527_v0  ;;  %451 = vmatprep.mubr.msk.f32.mxu1 %vm528_vm0, %v527_v0  ;;  %v58_v5 = vld [vmem:[#allocation2 + $0x100] sm:$0xff]  ;;  %v57_v7 = vld [vmem:[#allocation2 + $0xf8] sm:$0xff]  ;;  %v56_v8 = vld [vmem:[#allocation2 + $0xf0] sm:$0xff] }
  0x10   :  { %385 = vmatpush3.msra.mxu0 %v41_v1  ;;  %420 = vmatpush3.msra.mxu1 %v58_v5  ;;  %v36_v9 = vld [vmem:[#allocation2 + $0x50] sm:$0xff]  ;;  %v55_v10 = vld [vmem:[#allocation2 + $0xe8] sm:$0xff]  ;;  %v54_v12 = vld [vmem:[#allocation2 + $0xe0] sm:$0xff] }
  0x11   :  { %386 = vmatprep.subr.mxu0 %v527_v0  ;;  %421 = vmatprep.subr.mxu1 %v527_v0  ;;  %v35_v11 = vld [vmem:[#allocation2 + $0x48] sm:$0xff]  ;;  %v34_v13 = vld [vmem:[#allocation2 + $0x40] sm:$0xff]  ;;  %v53_v14 = vld [vmem:[#allocation2 + $0xd8] sm:$0xff] }
  0x12   :  { %387 = vmatpush3.msra.mxu0 %v40_v2  ;;  %422 = vmatpush3.msra.mxu1 %v57_v7  ;;  %v33_v15 = vld [vmem:[#allocation2 + $0x38] sm:$0xff]  ;;  %v52_v16 = vld [vmem:[#allocation2 + $0xd0] sm:$0xff]  ;;  %v31_v18 = vld [vmem:[#allocation2 + $0x28] sm:$0xff]  ;;  %v301_v7 = vlaneseq }
  0x13   :  { %388 = vmatprep.subr.mxu0 %v527_v0  ;;  %423 = vmatprep.subr.mxu1 %v527_v0  ;;  %v32_v17 = vld [vmem:[#allocation2 + $0x30] sm:$0xff]  ;;  %v30_v19 = vld [vmem:[#allocation2 + $0x20] sm:$0xff]  ;;  %v29_v20 = vld [vmem:[#allocation2 + $0x18] sm:$0xff] }
  0x14   :  { %389 = vmatpush3.msra.mxu0 %v39_v3  ;;  %424 = vmatpush3.msra.mxu1 %v56_v8  ;;  %v28_v21 = vld [vmem:[#allocation2 + $0x10] sm:$0xff]  ;;  %v27_v22 = vld [vmem:[#allocation2 + $0x8] sm:$0xff]  ;;  %v26_v23 = vld [vmem:[#allocation2] sm:$0xff] }
  0x15   :  { %390 = vmatprep.subr.mxu0 %v527_v0  ;;  %425 = vmatprep.subr.mxu1 %v527_v0  ;;  %v25_v24 = vld [vmem:[%s607_s0] sm:$0xff]  ;;  %v51_v25 = vld [vmem:[#allocation2 + $0xc8] sm:$0xff]  ;;  %v49_v27 = vld [vmem:[#allocation2 + $0xb8] sm:$0xff] }
  0x16   :  { %391 = vmatpush3.msra.mxu0 %v38_v4  ;;  %426 = vmatpush3.msra.mxu1 %v55_v10  ;;  %v50_v26 = vld [vmem:[#allocation2 + $0xc0] sm:$0xff]  ;;  %v48_v28 = vld [vmem:[#allocation2 + $0xb0] sm:$0xff]  ;;  %v47_v29 = vld [vmem:[#allocation2 + $0xa8] sm:$0xff] }
  0x17   :  { %392 = vmatprep.subr.mxu0 %v527_v0  ;;  %427 = vmatprep.subr.mxu1 %v527_v0  ;;  %v46_v30 = vld [vmem:[#allocation2 + $0xa0] sm:$0xff]  ;;  %v45_v31 = vld [vmem:[#allocation2 + $0x98] sm:$0xff]  ;;  %v44_v32 = vld [vmem:[#allocation2 + $0x90] sm:$0xff] }
  0x18   :  { %393 = vmatpush3.msra.mxu0 %v37_v6  ;;  %428 = vmatpush3.msra.mxu1 %v54_v12  ;;  %v43_v33 = vld [vmem:[#allocation2 + $0x88] sm:$0xff]  ;;  %v74_v35 = vld [vmem:[#allocation2 + $0x180] sm:$0xff]  ;;  %v73_v36 = vld [vmem:[#allocation2 + $0x178] sm:$0xff] }
  0x19   :  { %394 = vmatprep.subr.mxu0 %v527_v0  ;;  %429 = vmatprep.subr.mxu1 %v527_v0  ;;  %v75_v34 = vld [vmem:[#allocation2 + $0x188] sm:$0xff]  ;;  %v72_v37 = vld [vmem:[#allocation2 + $0x170] sm:$0xff]  ;;  %v70_v39 = vld [vmem:[#allocation2 + $0x160] sm:$0xff] }
  0x1a   :  { %395 = vmatpush3.msra.mxu0 %v36_v9  ;;  %430 = vmatpush3.msra.mxu1 %v53_v14  ;;  %v71_v38 = vld [vmem:[#allocation2 + $0x168] sm:$0xff]  ;;  %v69_v40 = vld [vmem:[#allocation2 + $0x158] sm:$0xff]  ;;  %v330_v41 = vld [vmem:[#allocation2 + $0x80] ss:$0 sm:$0xff] }
  0x1b   :  { %396 = vmatprep.subr.mxu0 %v527_v0  ;;  %431 = vmatprep.subr.mxu1 %v527_v0  ;;  %v68_v46 = vld [vmem:[#allocation2 + $0x150] sm:$0xff]  ;;  %v67_v47 = vld [vmem:[#allocation2 + $0x148] sm:$0xff]  ;;  %v66_v48 = vld [vmem:[#allocation2 + $0x140] sm:$0xff] }
  0x1c   :  { %397 = vmatpush3.msra.mxu0 %v35_v11  ;;  %432 = vmatpush3.msra.mxu1 %v52_v16  ;;  %v65_v49 = vld [vmem:[#allocation2 + $0x138] sm:$0xff]  ;;  %v64_v50 = vld [vmem:[#allocation2 + $0x130] sm:$0xff]  ;;  %v63_v51 = vld [vmem:[#allocation2 + $0x128] sm:$0xff]  ;;  %v302_v11 = vand.u32 127, %v301_v7 }
  0x1d   :  { %398 = vmatprep.subr.mxu0 %v527_v0  ;;  %433 = vmatprep.subr.mxu1 %v527_v0  ;;  %v62_v52 = vld [vmem:[#allocation2 + $0x120] sm:$0xff]  ;;  %v61_v53 = vld [vmem:[#allocation2 + $0x118] sm:$0xff]  ;;  %v60_v54 = vld [vmem:[#allocation2 + $0x110] sm:$0xff] }
  0x1e   :  { %399 = vmatpush3.msra.mxu0 %v34_v13  ;;  %434 = vmatpush3.msra.mxu1 %v51_v25  ;;  %v331_v55 = vld [vmem:[#allocation2 + $0x108] ss:$0 sm:$0xff]  ;;  %v332_v60 = vld [vmem:[#allocation2 + $0x190] ss:$0 sm:$0xff]  ;;  %vm303_vm2 = vcmp.lt.s32.totalorder %v302_v11, 2 }
  0x1f   :  { %400 = vmatprep.subr.mxu0 %v527_v0  ;;  %435 = vmatprep.subr.mxu1 %v527_v0 }
  0x20   :  { %401 = vmatpush3.msra.mxu0 %v33_v15  ;;  %436 = vmatpush3.msra.mxu1 %v50_v26 }
  0x21   :  { %402 = vmatprep.subr.mxu0 %v527_v0  ;;  %437 = vmatprep.subr.mxu1 %v527_v0 }
  0x22   :  { %403 = vmatpush3.msra.mxu0 %v32_v17  ;;  %438 = vmatpush3.msra.mxu1 %v49_v27 }
  0x23   :  { %404 = vmatprep.subr.mxu0 %v527_v0  ;;  %439 = vmatprep.subr.mxu1 %v527_v0 }
  0x24   :  { %405 = vmatpush3.msra.mxu0 %v31_v18  ;;  %440 = vmatpush3.msra.mxu1 %v48_v28 }
  0x25   :  { %406 = vmatprep.subr.mxu0 %v527_v0  ;;  %441 = vmatprep.subr.mxu1 %v527_v0 }
  0x26   :  { %407 = vmatpush3.msra.mxu0 %v30_v19  ;;  %442 = vmatpush3.msra.mxu1 %v47_v29 }
  0x27   :  { %408 = vmatprep.subr.mxu0 %v527_v0  ;;  %443 = vmatprep.subr.mxu1 %v527_v0 }
  0x28   :  { %409 = vmatpush3.msra.mxu0 %v29_v20  ;;  %444 = vmatpush3.msra.mxu1 %v46_v30 }
  0x29   :  { %410 = vmatprep.subr.mxu0 %v527_v0  ;;  %445 = vmatprep.subr.mxu1 %v527_v0 }
  0x2a   :  { %411 = vmatpush3.msra.mxu0 %v28_v21  ;;  %446 = vmatpush3.msra.mxu1 %v45_v31 }
  0x2b   :  { %412 = vmatprep.subr.mxu0 %v527_v0  ;;  %447 = vmatprep.subr.mxu1 %v527_v0 }
  0x2c   :  { %413 = vmatpush3.msra.mxu0 %v27_v22  ;;  %448 = vmatpush3.msra.mxu1 %v44_v32 }
  0x2d   :  { %414 = vmatprep.subr.mxu0 %v527_v0  ;;  %449 = vmatprep.subr.mxu1 %v527_v0 }
  0x2e   :  { %415 = vmatpush3.msra.mxu0 %v26_v23  ;;  %450 = vmatpush3.msra.mxu1 %v43_v33 }
  0x2f   :  { %417 = vmatmul.mubr.f32.vlgmr.msra.gmra.mxu0 %v25_v24  ;;  %454 = vmatprep.subr.mxu0 %v527_v0 }
  0x30   :  { %486 = vmatprep.mubr.msk.f32.mxu0 %vm528_vm0, %v527_v0  ;;  %455 = vmatpush3.msra.mxu0 %v75_v34 }
  0x31   :  { %456 = vmatprep.subr.mxu0 %v527_v0 }
  0x32   :  { %457 = vmatpush3.msra.mxu0 %v74_v35 }
  0x33   :  { %458 = vmatprep.subr.mxu0 %v527_v0 }
  0x34   :  { %459 = vmatpush3.msra.mxu0 %v73_v36 }
  0x35   :  { %460 = vmatprep.subr.mxu0 %v527_v0 }
  0x36   :  { %461 = vmatpush3.msra.mxu0 %v72_v37 }
  0x37   :  { %462 = vmatprep.subr.mxu0 %v527_v0 }
  0x38   :  { %463 = vmatpush3.msra.mxu0 %v71_v38 }
  0x39   :  { %464 = vmatprep.subr.mxu0 %v527_v0 }
  0x3a   :  { %465 = vmatpush3.msra.mxu0 %v70_v39 }
  0x3b   :  { %466 = vmatprep.subr.mxu0 %v527_v0 }
  0x3c   :  { %467 = vmatpush3.msra.mxu0 %v69_v40 }
  0x3d   :  { %468 = vmatprep.subr.mxu0 %v527_v0 }
  0x3e   :  { %469 = vmatpush3.msra.mxu0 %v68_v46 }
  0x3f   :  { %470 = vmatprep.subr.mxu0 %v527_v0 }
  0x40   :  { %471 = vmatpush3.msra.mxu0 %v67_v47 }
  0x41   :  { %472 = vmatprep.subr.mxu0 %v527_v0 }
  0x42   :  { %473 = vmatpush3.msra.mxu0 %v66_v48 }
  0x43   :  { %474 = vmatprep.subr.mxu0 %v527_v0 }
  0x44   :  { %475 = vmatpush3.msra.mxu0 %v65_v49 }
  0x45   :  { %476 = vmatprep.subr.mxu0 %v527_v0 }
  0x46   :  { %477 = vmatpush3.msra.mxu0 %v64_v50 }
  0x47   :  { %478 = vmatprep.subr.mxu0 %v527_v0 }
  0x48   :  { %479 = vmatpush3.msra.mxu0 %v63_v51 }
  0x49   :  { %480 = vmatprep.subr.mxu0 %v527_v0 }
  0x4a   :  { %481 = vmatpush3.msra.mxu0 %v62_v52 }
  0x4b   :  { %482 = vmatprep.subr.mxu0 %v527_v0 }
  0x4c   :  { %483 = vmatpush3.msra.mxu0 %v61_v53 }
  0x4d   :  { %484 = vmatprep.subr.mxu0 %v527_v0 }
  0x4e   :  { %485 = vmatpush3.msra.mxu0 %v60_v54 }
  0xef   :  { %v147_v42 = vpop.f32.mrf.mxu0 }
  0xf0   :  { %v148_v43 = vadd.f32 %v330_v41, %v147_v42 }
  0xf1   :  { %v418_v44 = vpop.f32.mrf.mxu0 }
  0xf2   :  { %494 = vtanh.f32 %v148_v43 }
  0xff   :  { %v495_v45 = vpop.eup %494 }
 0x100   :  { %452 = vmatmul.mubr.f32.vlgmr.msra.gmra.mxu1 %v495_v45 }
 0x1c0   :  { %v222_v56 = vpop.f32.mrf.mxu1 }
 0x1c1   :  { %v223_v57 = vadd.f32 %v331_v55, %v222_v56 }
 0x1c2   :  { %v453_v58 = vpop.f32.mrf.mxu1 }
 0x1c3   :  { %496 = vtanh.f32 %v223_v57 }
 0x1d0   :  { %v497_v59 = vpop.eup %496 }
 0x1d1   :  { %487 = vmatmul.mubr.f32.vlgmr.msra.gmra.mxu0 %v497_v59 }
 0x291   :  { %v297_v61 = vpop.f32.mrf.mxu0 }
 0x292   :  { %v298_v62 = vadd.f32 %v332_v60, %v297_v61 }
 0x293   :  { %v488_v63 = vpop.f32.mrf.mxu0 }
 0x294   :  { %v305_v1 = vsub.f32 0.0, %v298_v62  ;;  %v304_v14 = vmax.f32 %v298_v62, 0.0 }
 0x296   :  { %v308_v2 = vand.u32 2147483647, %v305_v1  ;;  %vm306_vm3 = vcmp.ne.f32.partialorder %v305_v1, %v305_v1 }
 0x298   :  { %v309_v3 = vsub.f32 0.0, %v308_v2 }
 0x29a   :  { %v310_v4 = vmul.f32 1.442695, %v309_v3 }
 0x29c   :  { %498 = vpow2.f32 %v310_v4 }
 0x2a9   :  { %v499_v5 = vpop.eup %498 }
 0x2aa   :  { %v312_v6 = vadd.f32 1.0, %v499_v5  ;;  %v315_v0 = vmul.f32 -0.5, %v499_v5  ;;  %v318_v9 = vand.u32 2147483647, %v499_v5 }
 0x2ac   :  { %500 = vlog2.f32 %v312_v6  ;;  %v316_v8 = vadd.f32 1.0, %v315_v0  ;;  %vm319_vm1 = vcmp.lt.f32.partialorder %v318_v9, 0.0004427343 }
 0x2ae   :  { %v317_v13 = vmul.f32 %v499_v5, %v316_v8 }
 0x2b9   :  { %v501_v10 = vpop.eup %500 }
 0x2ba   :  { %v314_v12 = vmul.f32 0.6931472, %v501_v10 }
 0x2bc   :  { %v320_v15 = vsel %vm319_vm1, %v317_v13, %v314_v12 }
 0x2bd   :  { %v321_v16 = vadd.f32 %v320_v15, %v304_v14 }
 0x2bf   :  { %v322_v17 = vsel %vm306_vm3, %v298_v62, %v321_v16 }
 0x2c0   :  { %v323_v18 = vsel %vm303_vm2, %v298_v62, %v322_v17 }
 0x2c1   :  { %324 = vst [vmem:[%s609_s2] sm:$0xff] %v323_v18 }
 0x2c2   :  { %329 = vsyncpa [#allocation3], 1 }

</bundles_post_ra>
